<compile_context>
chip_gen: v7x
topology: tpu7x:2x2x1
jax: 0.10.0
libtpu: 0.0.40
codegen_flags: <defaults>
</compile_context>

<pallas_src>
import numpy as np

import jax
import jax.numpy as jnp
from jax.experimental import pallas as pl
from jax.experimental.pallas import tpu as pltpu


# ----------------------------- activation -----------------------------------
def _mish(x):
    # mish(x) = x * tanh(softplus(x)); softplus with threshold 20 like torch.
    sp = jnp.where(x > 20.0, x, jnp.log1p(jnp.exp(jnp.minimum(x, 20.0))))
    return x * jnp.tanh(sp)


# ---------------------- pltpu.roll direction probe ---------------------------
def _probe_roll_matches_jnp():
    """One-off 8x128 probe that pins down pltpu.roll's rotation direction.

    Returns True if pltpu.roll(x, s, ax) == jnp.roll(x, s, ax) (out[i]=in[i-s]),
    False if it rotates the other way.  Makes the conv tap shifts robust to
    either convention.
    """
    def kern(x_ref, o_ref):
        o_ref[...] = pltpu.roll(x_ref[...], 1, 1)

    x = jax.lax.broadcasted_iota(jnp.float32, (8, 128), 1)
    y = np.asarray(
        pl.pallas_call(kern, out_shape=jax.ShapeDtypeStruct((8, 128), jnp.float32))(x)
    )
    if y[0, 0] == 127.0 and y[0, 1] == 0.0:
        return True
    if y[0, 0] == 1.0 and y[0, 1] == 2.0:
        return False
    raise RuntimeError(f"unexpected pltpu.roll semantics: {y[0, :3]}")


# ------------------------------ fused kernel ---------------------------------
def _make_kernel(layer_defs, H, W, n_out, roll_like_jnp):
    """Builds the whole-encoder kernel.  One grid step == one batch sample."""
    HW = H * W
    n_layers = len(layer_defs)

    def shift_lanes(x, s):
        # y[:, m] = x[:, (m + s) % HW]; wrap-around lanes are masked by caller.
        amt = (-s) % HW if roll_like_jnp else s % HW
        if amt == 0:
            return x
        return pltpu.roll(x, amt, 1)

    def kernel(*refs):
        # refs = (x, hh, ww, w0, b0, ..., w24, b24, fc_w, fc_b, out)
        x_ref, hh_ref, ww_ref = refs[0], refs[1], refs[2]
        conv_refs = refs[3:3 + 2 * n_layers]
        fc_w_ref = refs[3 + 2 * n_layers]
        fc_b_ref = refs[3 + 2 * n_layers + 1]
        out_ref = refs[-1]

        hh = hh_ref[...]          # (1, HW) int32: h index of each flat position
        ww = ww_ref[...]          # (1, HW) int32: w index of each flat position
        lidx = [0]

        def convbn(x, n_mish=1):
            """ConvBN (+ optional extra Mish): per-tap rolled masked dots."""
            d = layer_defs[lidx[0]]
            w_ref = conv_refs[2 * lidx[0]]
            b_ref = conv_refs[2 * lidx[0] + 1]
            lidx[0] += 1
            kh, kw, cin, cout = d["kh"], d["kw"], d["cin"], d["cout"]
            assert x.shape == (cin, HW), (x.shape, d)
            ph, pw = (kh - 1) // 2, (kw - 1) // 2
            acc = jnp.zeros((cout, HW), jnp.float32)
            tap = 0
            for i in range(kh):
                di = i - ph
                for j in range(kw):
                    dj = j - pw
                    xs = shift_lanes(x, di * W + dj)
                    conds = []
                    if di > 0:
                        conds.append(hh < H - di)
                    elif di < 0:
                        conds.append(hh >= -di)
                    if dj > 0:
                        conds.append(ww < W - dj)
                    elif dj < 0:
                        conds.append(ww >= -dj)
                    if conds:
                        mask = conds[0]
                        for extra in conds[1:]:
                            mask = jnp.logical_and(mask, extra)
                        xs = xs * mask.astype(jnp.float32)
                    # BN scale is already folded into w (build time).
                    acc = acc + jnp.dot(
                        w_ref[tap], xs, preferred_element_type=jnp.float32
                    )
                    tap += 1
            y = acc + b_ref[...]                  # fused conv-bias + BN shift
            for _ in range(n_mish):
                y = _mish(y)
            return y

        def conv_seq(x, count):
            for _ in range(count):
                x = convbn(x)
            return x

        def conv_block(x):
            x1 = conv_seq(x, 3)                   # (1,9), (9,1), (1,1)
            x2 = x1
            for _ in range(2):                    # ResBlock(nblocks=2)
                h = convbn(x2, n_mish=2)          # ConvBN(1,1) + extra Mish
                h = convbn(h, n_mish=2)           # ConvBN(3,3) + extra Mish
                x2 = x2 + h                       # residual add fused in-kernel
            x2 = conv_seq(x2, 3)                  # (1,7), (7,1), (1,1)
            return _mish(x1 + x2)                 # ConvBlock epilogue fused

        x = x_ref[0].astype(jnp.float32)          # (Cin, HW), lane-dense
        x = convbn(x)                             # conv1: ConvBN(2 -> n_c, 3x3)
        x1 = conv_block(x)                        # enc1
        x2 = conv_seq(x, 3)                       # enc2: (1,5), (5,1), (3,3)
        xm = jnp.concatenate([x1, x2], axis=0)    # torch.cat([x1, x2], dim=1)
        xm = conv_block(xm)                       # merge[0]: ConvBlock(2*n_c)
        xm = convbn(xm)                           # merge[1]: ConvBN(2*n_c -> 4)
        assert lidx[0] == n_layers

        # Fused Linear + Sigmoid (fc weights already in (c, h*w, out) order).
        # TODO(synk): nn.Dropout(drop) with drop=0 is an identity; not emitted.
        acc = jnp.zeros((1, n_out), jnp.float32)
        for c in range(xm.shape[0]):
            acc = acc + jnp.dot(
                xm[c:c + 1, :], fc_w_ref[c], preferred_element_type=jnp.float32
            )
        out_ref[0] = jax.nn.sigmoid(acc + fc_b_ref[...])

    return kernel


# ------------------------------ entry point ----------------------------------
def build_forward(layer_defs, H, W, n_out, roll_like_jnp):
    HW = H * W
    cin0 = layer_defs[0]["cin"]
    kernel = _make_kernel(layer_defs, H, W, n_out, roll_like_jnp)

    def _const_spec(shape):
        nd = len(shape)
        return pl.BlockSpec(shape, lambda b, _nd=nd: (0,) * _nd)

    in_specs = [
        pl.BlockSpec((1, cin0, HW), lambda b: (b, 0, 0)),     # per-sample input
        _const_spec((1, HW)),                                 # hh
        _const_spec((1, HW)),                                 # ww
    ]
    for d in layer_defs:
        in_specs.append(_const_spec((d["kh"] * d["kw"], d["cout"], d["cin"])))
        in_specs.append(_const_spec((d["cout"], 1)))
    in_specs.append(_const_spec((4, HW, n_out)))              # fc weight
    in_specs.append(_const_spec((1, n_out)))                  # fc bias
    out_specs = pl.BlockSpec((1, 1, n_out), lambda b: (b, 0, 0))

    @jax.jit
    def forward(x_nchw, conv_arrays, fc_w, fc_b):
        n = x_nchw.shape[0]
        # NCHW -> (N, C, H*W): contiguous reshape, no transpose needed.
        x = x_nchw.reshape(n, cin0, HW).astype(jnp.float32)
        pos = jnp.arange(HW, dtype=jnp.int32)
        hh = (pos // W).reshape(1, HW)
        ww = (pos % W).reshape(1, HW)
        out = pl.pallas_call(
            kernel,
            grid=(n,),
            in_specs=in_specs,
            out_specs=out_specs,
            out_shape=jax.ShapeDtypeStruct((n, 1, n_out), jnp.float32),
            compiler_params=pltpu.CompilerParams(
                dimension_semantics=("parallel",),
            ),
        )(x, hh, ww, *conv_arrays, fc_w, fc_b)
        return out.reshape(n, n_out)

    return forward


# --------------------------- parameter building ------------------------------
def _init_convbn(key, cin, cout, kh, kw):
    kw_, kb, kg, kbe = jax.random.split(key, 4)
    fan_in = cin * kh * kw
    w = jax.random.normal(kw_, (kh * kw, cout, cin), jnp.float32) / np.sqrt(fan_in)
    b = 0.1 * jax.random.normal(kb, (cout,), jnp.float32)
    gamma = 1.0 + 0.1 * jax.random.normal(kg, (cout,), jnp.float32)
    beta = 0.1 * jax.random.normal(kbe, (cout,), jnp.float32)
    rmean = jnp.zeros((cout,), jnp.float32)
    rvar = jnp.ones((cout,), jnp.float32)
    eps = 1e-5
    s = gamma / jnp.sqrt(rvar + eps)
    return {
        "kh": kh, "kw": kw, "cin": cin, "cout": cout,
        # BN scale folded into the conv weights (review item):
        "w": w * s[None, :, None],
        # conv bias + BN shift folded into one per-channel shift:
        "b": (b * s + beta - rmean * s).reshape(cout, 1),
    }


def build_params(key, bits, dim1, dim2, n_c):
    cnt = [0]

    def nk():
        cnt[0] += 1
        return jax.random.fold_in(key, cnt[0])

    def convblock_defs(c):
        return [
            _init_convbn(nk(), c, c, 1, 9),   # conv1 sequence
            _init_convbn(nk(), c, c, 9, 1),
            _init_convbn(nk(), c, c, 1, 1),
            _init_convbn(nk(), c, c, 1, 1),   # ResBlock #1
            _init_convbn(nk(), c, c, 3, 3),
            _init_convbn(nk(), c, c, 1, 1),   # ResBlock #2
            _init_convbn(nk(), c, c, 3, 3),
            _init_convbn(nk(), c, c, 1, 7),   # conv2 sequence
            _init_convbn(nk(), c, c, 7, 1),
            _init_convbn(nk(), c, c, 1, 1),
        ]

    layers = [_init_convbn(nk(), 2, n_c, 3, 3)]          # conv1
    layers += convblock_defs(n_c)                        # enc1
    layers += [_init_convbn(nk(), n_c, n_c, 1, 5),       # enc2
               _init_convbn(nk(), n_c, n_c, 5, 1),
               _init_convbn(nk(), n_c, n_c, 3, 3)]
    layers += convblock_defs(2 * n_c)                    # merge ConvBlock
    layers.append(_init_convbn(nk(), 2 * n_c, 4, 1, 1))  # merge proj -> 4 ch

    hw = dim1 * dim2
    n_out = bits // 4                                    # CREncoder.B == 4
    # fc weight stored as (4, H*W, n_out): rows are pre-permuted to the
    # kernel's channel-major (c, h*W + w) flattening -> no runtime transpose.
    fc_w = jax.random.normal(nk(), (4, hw, n_out), jnp.float32) / np.sqrt(4 * hw)
    fc_b = (0.1 * jax.random.normal(nk(), (n_out,), jnp.float32)).reshape(1, n_out)
    return layers, fc_w, fc_b


# --------------------------------- main ---------------------------------------
if __name__ == "__main__":
    key = jax.random.PRNGKey(0)
    batch, in_ch = 2, 2
    dim1, dim2, n_c, bits = 8, 16, 8, 16        # small shapes, H*W = 128 lanes

    roll_like_jnp = _probe_roll_matches_jnp()

    layer_defs, fc_w, fc_b = build_params(
        jax.random.fold_in(key, 1), bits, dim1, dim2, n_c)
    conv_arrays = []
    for d in layer_defs:
        conv_arrays += [d["w"], d["b"]]

    x = jax.random.normal(jax.random.fold_in(key, 2),
                          (batch, in_ch, dim1, dim2), jnp.float32)

    forward = build_forward(layer_defs, dim1, dim2, bits // 4, roll_like_jnp)
    out = jax.block_until_ready(forward(x, tuple(conv_arrays), fc_w, fc_b))

    assert out.shape == (batch, bits // 4)
    assert bool(jnp.all(jnp.isfinite(out)))
    print("KERNEL_OK")
</pallas_src>

<mosaic_0001>
module attributes {stable_mosaic.version = 11 : i64} {
  func.func @kern(%arg0: memref<8x128xf32, #tpu.memory_space<vmem>>, %arg1: memref<8x128xf32, #tpu.memory_space<vmem>>) attributes {dimension_semantics = [], scalar_prefetch = 0 : i64, scratch_operands = 0 : i64, tpu.core_type = #tpu.core_type<tc>} {
    %c0 = arith.constant 0 : index
    %c0_0 = arith.constant 0 : index
    %0 = vector.load %arg0[%c0, %c0_0] : memref<8x128xf32, #tpu.memory_space<vmem>>, vector<8x128xf32>
    %c1_i32 = arith.constant 1 : i32
    %1 = tpu.dynamic_rotate %0 by %c1_i32 dim 1 : vector<8x128xf32>, i32 -> vector<8x128xf32>
    %c0_1 = arith.constant 0 : index
    %c0_2 = arith.constant 0 : index
    %2 = vector.load %arg1[%c0_1, %c0_2] : memref<8x128xf32, #tpu.memory_space<vmem>>, vector<8x128xf32>
    tpu.vector_store %arg1[%c0_1, %c0_2], %1 {strides = array<i32>} : memref<8x128xf32, #tpu.memory_space<vmem>>, vector<8x128xf32>,
    return
  }
}

</mosaic_0001>

<bundles_post_ra>
// kernel: tpu_custom_call.1
= control target key start
LH: loop header
LB: loop body
LE: loop exit
PB: predicated region body
PF: predicated region fallthrough
CT: control target
= control target key end

     0   :  { %6 = vsyncpa [#allocation3], 0  ;;  %s128_s0 = inlined_call_operand.hbm [shape: f32[8,128], index: 0, kind: input, shape index: {}]   ;;  %s129_s1 = inlined_call_operand.hbm [shape: f32[8,128], index: 1, kind: output, shape index: {}]  }
   0x1   :  { %7 = vsyncpa [#allocation4], 0  ;;  %s91_s6 = smov [#allocation2]   ;;  %s43_s10 = scalar_lea.hbm %s128_s0, 128 }
   0x2   :  { %s14_s7 = sshll.u32 %s91_s6, 4  ;;  %p44_p0 = scmp.ne.s32.totalorder %s128_s0, %s43_s10  ;;  %s15_s7 = int_to_ptr.vmem [resolvable:$true] %s14_s7 }
   0x3   :  { %p47_p1 = scmp.lt.u32.totalorder %s43_s10, %s128_s0 }
   0x5   :  { %p49_p2 = pnand %p47_p1, %p44_p0 }
   0x7   :  { %52 = shalt.err (!%p49_p2)
}
   0x8   :  { %s53_s15 = scalar_lea.vmem %s15_s7, 128  ;;  %p58_p4 = scmp.lt.s32.totalorder %s15_s7, %s15_s7 }
   0x9   :  { %p54_p3 = scmp.ne.s32.totalorder %s15_s7, %s53_s15  ;;  %p59_p5 = scmp.lt.s32.totalorder %s53_s15, %s53_s15 }
   0xb   :  { %p60_p6 = por %p59_p5, %p58_p4 }
   0xd   :  { %p61_p7 = pnand %p60_p6, %p54_p3 }
   0xf   :  { %64 = shalt.err (!%p61_p7)
}
  0x10   :  { %17 = dma.hbm_to_vmem [thread:$0]  %s128_s0, 128, %s15_s7, [#allocation3]  }
  0x11   :  { %87 = dma.done.wait [#allocation3], 128  }
  0x12   :  { %88 = vsyncadd [#allocation3], 4294967168  ;;  %v21_v0 = vld [vmem:[#allocation2] sm:$0xff]  ;;  %s92_s18 = smov 1   ;;  %s93_s19 = smov [#allocation5]  }
  0x13   :  { %22 = vrot.lane.b32.xlu0 %v21_v0, %s92_s18  ;;  %s31_s20 = sshll.u32 %s93_s19, 4  ;;  %s32_s20 = int_to_ptr.vmem [resolvable:$true] %s31_s20 }
  0x14   :  { %s65_s21 = scalar_lea.vmem %s32_s20, 128  ;;  %p70_p9 = scmp.lt.s32.totalorder %s32_s20, %s32_s20 }
  0x15   :  { %p66_p8 = scmp.ne.s32.totalorder %s32_s20, %s65_s21  ;;  %p71_p10 = scmp.lt.s32.totalorder %s65_s21, %s65_s21 }
  0x17   :  { %p72_p11 = por %p71_p10, %p70_p9 }
  0x19   :  { %p73_p12 = pnand %p72_p11, %p66_p8 }
  0x85   :  { %v23_v1 = vpop.permute.xlu0 %22 }
  0x86   :  { %24 = vst [vmem:[#allocation5] sm:$0xff] %v23_v1 }
  0x87   :  { %76 = shalt.err (!%p73_p12)
}
  0x88   :  { %s77_s0 = scalar_lea.hbm %s129_s1, 128 }
  0x89   :  { %p78_p13 = scmp.ne.s32.totalorder %s129_s1, %s77_s0  ;;  %p81_p0 = scmp.lt.u32.totalorder %s77_s0, %s129_s1 }
  0x8b   :  { %p83_p1 = pnand %p81_p0, %p78_p13 }
  0x8d   :  { %86 = shalt.err (!%p83_p1)
}
  0x8e   :  { %34 = dma.vmem_to_hbm [thread:$0]  %s32_s20, 128, %s129_s1, [#allocation4]  }
  0x8f   :  { %89 = dma.done.wait [#allocation4], 128  }
  0x90   :  { %90 = vsyncadd [#allocation4], 4294967168 }
  0x91   :  { %38 = vsyncpa [#allocation3], 1 }
  0x92   :  { %39 = vsyncpa [#allocation4], 1 }

</bundles_post_ra>
